<compile_context>
chip_gen: v7x
topology: tpu7x:2x2x1
jax: 0.10.0
libtpu: 0.0.40
codegen_flags: <defaults>
</compile_context>

<pallas_src>
import jax
import jax.numpy as jnp
from jax.experimental import pallas as pl
from jax.experimental.pallas import tpu as pltpu


_TARGET_BLOCK_BYTES = 8 * 1024 * 1024   # ~8 MiB blocks (v7x-tuned, fine on v5e/v6e)
_VMEM_LIMIT_BYTES = 40 * 1024 * 1024    # 4 x 8 MiB double-buffered + headroom
_LANE_CANDIDATES = (1024, 512, 256, 128)  # lane-dense last dims (multiples of 128)


def _identity_kernel(x_ref, o_ref):
    # Base-class Quantizer pass-through: y = x.  A concrete subclass would put
    # its scale / round / clamp math here instead of the plain copy.
    o_ref[...] = x_ref[...]


def quantizer_forward(x):
    """Identity quantizer forward pass (Quantizer base-class semantics).

    Args:
      x: array of any shape / dtype (e.g. NCHW conv activations).
    Returns:
      Array with identical shape, dtype and values.
    """
    orig_shape = x.shape
    dtype = x.dtype
    itemsize = jnp.dtype(dtype).itemsize
    total = x.size

    # Pick the widest lane-dense last dim that divides the element count.
    lane = None
    for cand in _LANE_CANDIDATES:
        if total >= cand and total % cand == 0:
            lane = cand
            break
    if lane is None:
        # TODO(synk): element count not a multiple of 128 — for the identity
        # base class a zero-traffic pass-through is strictly cheaper than any
        # copy kernel, so return x directly instead of padding.
        return x

    rows = total // lane

    # Sublane multiple is dtype dependent: f32 -> 8, bf16 -> 16, int8/fp8 -> 32.
    sublane_mult = 8 * max(1, 4 // itemsize)
    max_block_rows = max(
        sublane_mult,
        (_TARGET_BLOCK_BYTES // (lane * itemsize)) // sublane_mult * sublane_mult,
    )
    # block_rows is either a multiple of the packed-sublane tile or the full
    # row extent (which lifts the (8,128) divisibility constraint).  The
    # ragged final block (when block_rows does not divide rows) is masked by
    # Pallas — no pad / slice copies in the wrapper.
    block_rows = min(rows, max_block_rows)
    grid = (pl.cdiv(rows, block_rows),)

    x2d = x.reshape(rows, lane)

    y2d = pl.pallas_call(
        _identity_kernel,
        out_shape=jax.ShapeDtypeStruct((rows, lane), dtype),
        grid_spec=pltpu.PrefetchScalarGridSpec(
            num_scalar_prefetch=0,
            grid=grid,
            in_specs=[pl.BlockSpec((block_rows, lane), lambda i: (i, 0))],
            out_specs=pl.BlockSpec((block_rows, lane), lambda i: (i, 0)),
        ),
        compiler_params=pltpu.CompilerParams(
            # TODO(synk): on v7x verify in the trace that both TensorCores
            # participate; if only one TC is active switch this axis to
            # pltpu.CORE_PARALLEL (blocks are disjoint, so it stays safe).
            dimension_semantics=("parallel",),
            vmem_limit_bytes=_VMEM_LIMIT_BYTES,
        ),
        cost_estimate=pl.CostEstimate(
            flops=0,
            transcendentals=0,
            bytes_accessed=2 * rows * lane * itemsize,
        ),
    )(x2d)

    return y2d.reshape(orig_shape)


if __name__ == "__main__":
    key = jax.random.PRNGKey(0)
    # Small NCHW input consistent with a conv-activation quantizer.
    x = jax.random.normal(key, (2, 4, 16, 16), dtype=jnp.float32)

    forward = jax.jit(quantizer_forward)
    y = forward(x)
    y = jax.block_until_ready(y)

    assert y.shape == x.shape and y.dtype == x.dtype
    assert jnp.array_equal(y, x)
    print("KERNEL_OK")
</pallas_src>

<mosaic_0001>
module attributes {stable_mosaic.version = 11 : i64} {
  func.func @_identity_kernel(%arg0: i32, %arg1: memref<2x1024xf32, #tpu.memory_space<vmem>>, %arg2: memref<2x1024xf32, #tpu.memory_space<vmem>>) attributes {dimension_semantics = [#tpu.dimension_semantics<parallel>], iteration_bounds = array<i64: 1>, scalar_prefetch = 0 : i64, scratch_operands = 0 : i64, tpu.core_type = #tpu.core_type<tc>, window_params = [{transform_indices = @transform_0, window_bounds = array<i64: 2, 1024>}, {transform_indices = @transform_1, window_bounds = array<i64: 2, 1024>}]} {
    %c0 = arith.constant 0 : index
    %c0_0 = arith.constant 0 : index
    %0 = vector.load %arg1[%c0, %c0_0] : memref<2x1024xf32, #tpu.memory_space<vmem>>, vector<2x1024xf32>
    %c0_1 = arith.constant 0 : index
    %c0_2 = arith.constant 0 : index
    %1 = vector.load %arg2[%c0_1, %c0_2] : memref<2x1024xf32, #tpu.memory_space<vmem>>, vector<2x1024xf32>
    tpu.vector_store %arg2[%c0_1, %c0_2], %0 {strides = array<i32>} : memref<2x1024xf32, #tpu.memory_space<vmem>>, vector<2x1024xf32>,
    return
  }
  func.func @transform_0(%arg0: i32) -> (i32, i32) {
    %c0_i32 = arith.constant 0 : i32
    %c0_i32_0 = arith.constant 0 : i32
    return %arg0, %c0_i32 : i32, i32
  }
  func.func @transform_1(%arg0: i32) -> (i32, i32) {
    %c0_i32 = arith.constant 0 : i32
    %c0_i32_0 = arith.constant 0 : i32
    return %arg0, %c0_i32 : i32, i32
  }
}

</mosaic_0001>

<bundles_post_ra>
// kernel: quantizer_forward.1
= control target key start
LH: loop header
LB: loop body
LE: loop exit
PB: predicated region body
PF: predicated region fallthrough
CT: control target
= control target key end

     0   :  { %s38_s0 = inlined_call_operand.vmem [shape: f32[2,1024], index: 0, kind: input, shape index: {}]   ;;  %s39_s1 = inlined_call_operand.vmem [shape: f32[2,1024], index: 1, kind: output, shape index: {}]  }
   0x1   :  { %v8_v0 = vld [vmem:[%s38_s0] sm:$0xff]  ;;  %v9_v1 = vld [vmem:[%s38_s0 + $0x8] sm:$0xff] }
   0x2   :  { %10 = vst [vmem:[%s39_s1] sm:$0xff] %v8_v0  ;;  %11 = vst [vmem:[%s39_s1 + $0x8] sm:$0xff] %v9_v1 }

</bundles_post_ra>
